<compile_context>
chip_gen: v5e
topology: v5e:2x2
jax: 0.10.0
libtpu: 0.0.40
codegen_flags: <defaults>
</compile_context>

<pallas_src>
import functools

import numpy as np
import jax
import jax.numpy as jnp
from jax.experimental import pallas as pl
from jax.experimental.pallas import tpu as pltpu


def _round_up(x, m):
    return ((x + m - 1) // m) * m


def cb_loss_kernel(logits_ref, labels_ref, clsw_ref, out_ref, *, scale):
    """One batch tile of the class-balanced softmax-BCE loss (accumulating)."""
    pid = pl.program_id(0)
    n_tiles = pl.num_programs(0)
    TB = logits_ref.shape[0]

    @pl.when(pid == 0)
    def _init():
        out_ref[...] = jnp.zeros_like(out_ref)

    logits = logits_ref[...].astype(jnp.float32)                  # (TB, C)
    C = logits.shape[1]

    # labels stay whole-array resident in VMEM; slice this tile's rows.
    start = pl.multiple_of(pid * TB, 8)
    labels = labels_ref[pl.ds(start, TB), :]                      # (TB, 1) int32
    clsw = clsw_ref[...]                                          # (1, C) f32

    class_ids = jax.lax.broadcasted_iota(jnp.int32, (TB, C), 1)
    mask = class_ids == labels                                    # (TB, C) bool

    # per-sample weight = class weight at the true label
    # (padded rows carry label = -1 -> mask all False -> weight 0)
    w = jnp.sum(jnp.where(mask, clsw, 0.0), axis=1, keepdims=True)  # (TB, 1)

    # log-softmax intermediates (no log(p), no element-wise divide)
    m = jnp.max(logits, axis=1, keepdims=True)
    shifted = logits - m
    e = jnp.exp(shifted)                                          # 1 exp / element
    row_sum = jnp.sum(e, axis=1, keepdims=True)                   # (TB, 1)
    log_row_sum = jnp.log(row_sum)                                # 1 log / row

    # PyTorch BCE clamps log terms at -100
    log_p = jnp.maximum(shifted - log_row_sum, -100.0)
    log_1mp = jnp.maximum(jnp.log(row_sum - e) - log_row_sum, -100.0)  # 1 log / element

    bce = jnp.where(mask, -log_p, -log_1mp)                       # (TB, C)
    row_bce = jnp.sum(bce, axis=1, keepdims=True)                 # (TB, 1)
    partial = jnp.sum(w * row_bce, axis=0, keepdims=True)         # (1, 1)

    out_ref[...] += partial

    @pl.when(pid == n_tiles - 1)
    def _finalize():
        out_ref[...] = out_ref[...] * scale


def cb_loss(logits, labels, samples_per_cls, no_of_classes, beta=0.9999,
            batch_tile=256):
    """Pallas CB_loss forward. logits: (B, C) float, labels: (B,) int."""
    # host-side class-weight setup (mirrors the numpy glue in the PyTorch module)
    effective_num = 1.0 - np.power(beta, np.asarray(samples_per_cls, dtype=np.float64))
    weights = (1.0 - beta) / effective_num
    weights = weights / np.sum(weights) * no_of_classes
    clsw = jnp.asarray(weights, dtype=jnp.float32).reshape(1, no_of_classes)

    B, C = logits.shape
    TB = min(batch_tile, _round_up(B, 8))     # sublane-aligned batch tile
    B_pad = _round_up(B, TB)

    labels_i = labels.astype(jnp.int32)
    if B_pad != B:
        # padded rows: label -1 -> zero weight -> zero contribution to the sum
        logits = jnp.pad(logits, ((0, B_pad - B), (0, 0)))
        labels_i = jnp.pad(labels_i, ((0, B_pad - B),), constant_values=-1)
    labels2d = labels_i.reshape(B_pad, 1)

    kernel = functools.partial(cb_loss_kernel, scale=1.0 / (B * C))

    out = pl.pallas_call(
        kernel,
        out_shape=jax.ShapeDtypeStruct((1, 1), jnp.float32),
        grid=(B_pad // TB,),
        in_specs=[
            # logits: batch-tiled, native dtype (cast to f32 inside the kernel)
            pl.BlockSpec((TB, C), lambda i: (i, 0)),
            # labels / class weights: tiny, whole-array resident in VMEM
            pl.BlockSpec(memory_space=pltpu.MemorySpace.VMEM),
            pl.BlockSpec(memory_space=pltpu.MemorySpace.VMEM),
        ],
        # resident (1,1) accumulator across the (reduction) batch-grid axis
        out_specs=pl.BlockSpec((1, 1), lambda i: (0, 0)),
        compiler_params=pltpu.CompilerParams(
            dimension_semantics=("arbitrary",),
        ),
    )(logits, labels2d, clsw)
    return out[0, 0]


def cb_loss_ref(logits, labels, samples_per_cls, no_of_classes, beta=0.9999):
    """Pure-JAX reference for validation."""
    effective_num = 1.0 - np.power(beta, np.asarray(samples_per_cls, dtype=np.float64))
    weights = (1.0 - beta) / effective_num
    weights = weights / np.sum(weights) * no_of_classes
    weights = jnp.asarray(weights, dtype=jnp.float32)

    one_hot = jax.nn.one_hot(labels, no_of_classes, dtype=jnp.float32)
    w = jnp.sum(weights[None, :] * one_hot, axis=1, keepdims=True)
    p = jax.nn.softmax(logits.astype(jnp.float32), axis=1)
    log_p = jnp.maximum(jnp.log(p), -100.0)
    log_1mp = jnp.maximum(jnp.log(1.0 - p), -100.0)
    bce = -(one_hot * log_p + (1.0 - one_hot) * log_1mp)
    return jnp.mean(w * bce)


if __name__ == "__main__":
    B, C = 8, 16
    key = jax.random.PRNGKey(0)
    k1, k2 = jax.random.split(key)
    logits = jax.random.normal(k1, (B, C), dtype=jnp.float32)
    labels = jax.random.randint(k2, (B,), 0, C)
    samples_per_cls = [int(x) for x in (10 + 5 * np.arange(C))]

    loss = cb_loss(logits, labels, samples_per_cls, C, beta=0.9999)
    jax.block_until_ready(loss)

    ref = cb_loss_ref(logits, labels, samples_per_cls, C, beta=0.9999)
    np.testing.assert_allclose(np.asarray(loss), np.asarray(ref), rtol=1e-3, atol=1e-5)

    print("KERNEL_OK")
</pallas_src>

<mosaic_0001>
module attributes {stable_mosaic.version = 11 : i64} {
  func.func @cb_loss_kernel(%arg0: i32, %arg1: memref<8x16xf32, #tpu.memory_space<vmem>>, %arg2: memref<8x1xi32, #tpu.memory_space<vmem>>, %arg3: memref<1x16xf32, #tpu.memory_space<vmem>>, %arg4: memref<1x1xf32, #tpu.memory_space<vmem>>) attributes {dimension_semantics = [#tpu.dimension_semantics<arbitrary>], iteration_bounds = array<i64: 1>, scalar_prefetch = 0 : i64, scratch_operands = 0 : i64, tpu.core_type = #tpu.core_type<tc>, window_params = [{transform_indices = @transform_0, window_bounds = array<i64: 8, 16>}, {pipeline_mode = #tpu.pipeline_mode<synchronous>, transform_indices = @transform_1, window_bounds = array<i64: 8, 1>}, {pipeline_mode = #tpu.pipeline_mode<synchronous>, transform_indices = @transform_2, window_bounds = array<i64: 1, 16>}, {pipeline_mode = #tpu.pipeline_mode<synchronous>, transform_indices = @transform_3, window_bounds = array<i64: 1, 1>}]} {
    %c0_i32 = arith.constant 0 : i32
    %0 = arith.cmpi eq, %arg0, %c0_i32 : i32
    %1 = arith.extui %0 : i1 to i32
    %c0_i32_0 = arith.constant 0 : i32
    %2 = arith.cmpi ne, %1, %c0_i32_0 : i32
    scf.if %2 {
      %cst_20 = arith.constant 0.000000e+00 : f32
      %53 = vector.broadcast %cst_20 : f32 to vector<1x1xf32>
      %c0_21 = arith.constant 0 : index
      %c0_22 = arith.constant 0 : index
      %54 = vector.load %arg4[%c0_21, %c0_22] : memref<1x1xf32, #tpu.memory_space<vmem>>, vector<1x1xf32>
      tpu.vector_store %arg4[%c0_21, %c0_22], %53 {strides = array<i32>} : memref<1x1xf32, #tpu.memory_space<vmem>>, vector<1x1xf32>,
    } else {
    }
    %c0 = arith.constant 0 : index
    %c0_1 = arith.constant 0 : index
    %3 = vector.load %arg1[%c0, %c0_1] : memref<8x16xf32, #tpu.memory_space<vmem>>, vector<8x16xf32>
    %c8_i32 = arith.constant 8 : i32
    %4 = arith.muli %arg0, %c8_i32 : i32
    %5 = tpu.assume_multiple %4, 8 : i32
    %6 = arith.index_cast %5 : i32 to index
    %c0_2 = arith.constant 0 : index
    %7 = vector.load %arg2[%6, %c0_2] : memref<8x1xi32, #tpu.memory_space<vmem>>, vector<8x1xi32>
    %c0_3 = arith.constant 0 : index
    %c0_4 = arith.constant 0 : index
    %8 = vector.load %arg3[%c0_3, %c0_4] : memref<1x16xf32, #tpu.memory_space<vmem>>, vector<1x16xf32>
    %9 = tpu.iota {dimensions = array<i32: 1>} : vector<8x16xi32>
    %10 = vector.broadcast %7 : vector<8x1xi32> to vector<8x16xi32>
    %11 = arith.cmpi eq, %9, %10 : vector<8x16xi32>
    %cst = arith.constant 0.000000e+00 : f32
    %12 = vector.shape_cast %8 : vector<1x16xf32> to vector<1x16xf32>
    %13 = vector.broadcast %12 : vector<1x16xf32> to vector<8x16xf32>
    %14 = vector.broadcast %cst : f32 to vector<8x16xf32>
    %15 = arith.select %11, %13, %14 : vector<8x16xi1>, vector<8x16xf32>
    %cst_5 = arith.constant dense<0.000000e+00> : vector<8xf32>
    %16 = vector.multi_reduction <add>, %15, %cst_5 [1] : vector<8x16xf32> to vector<8xf32>
    %17 = vector.shape_cast %16 : vector<8xf32> to vector<8x1xf32>
    %cst_6 = arith.constant dense<0xFF800000> : vector<8xf32>
    %18 = vector.multi_reduction <maximumf>, %3, %cst_6 [1] : vector<8x16xf32> to vector<8xf32>
    %19 = vector.shape_cast %18 : vector<8xf32> to vector<8x1xf32>
    %20 = vector.broadcast %19 : vector<8x1xf32> to vector<8x16xf32>
    %21 = arith.subf %3, %20 : vector<8x16xf32>
    %22 = math.exp %21 : vector<8x16xf32>
    %cst_7 = arith.constant dense<0.000000e+00> : vector<8xf32>
    %23 = vector.multi_reduction <add>, %22, %cst_7 [1] : vector<8x16xf32> to vector<8xf32>
    %24 = vector.shape_cast %23 : vector<8xf32> to vector<8x1xf32>
    %25 = math.log %24 : vector<8x1xf32>
    %26 = vector.broadcast %25 : vector<8x1xf32> to vector<8x16xf32>
    %27 = arith.subf %21, %26 : vector<8x16xf32>
    %cst_8 = arith.constant -1.000000e+02 : f32
    %28 = vector.broadcast %cst_8 : f32 to vector<8x16xf32>
    %29 = arith.maximumf %27, %28 : vector<8x16xf32>
    %30 = vector.broadcast %24 : vector<8x1xf32> to vector<8x16xf32>
    %31 = arith.subf %30, %22 : vector<8x16xf32>
    %32 = math.log %31 : vector<8x16xf32>
    %33 = vector.broadcast %25 : vector<8x1xf32> to vector<8x16xf32>
    %34 = arith.subf %32, %33 : vector<8x16xf32>
    %cst_9 = arith.constant -1.000000e+02 : f32
    %35 = vector.broadcast %cst_9 : f32 to vector<8x16xf32>
    %36 = arith.maximumf %34, %35 : vector<8x16xf32>
    %cst_10 = arith.constant 0.000000e+00 : f32
    %37 = vector.broadcast %cst_10 : f32 to vector<8x16xf32>
    %38 = arith.subf %37, %29 : vector<8x16xf32>
    %cst_11 = arith.constant 0.000000e+00 : f32
    %39 = vector.broadcast %cst_11 : f32 to vector<8x16xf32>
    %40 = arith.subf %39, %36 : vector<8x16xf32>
    %41 = arith.select %11, %38, %40 : vector<8x16xi1>, vector<8x16xf32>
    %cst_12 = arith.constant dense<0.000000e+00> : vector<8xf32>
    %42 = vector.multi_reduction <add>, %41, %cst_12 [1] : vector<8x16xf32> to vector<8xf32>
    %43 = vector.shape_cast %42 : vector<8xf32> to vector<8x1xf32>
    %44 = arith.mulf %17, %43 : vector<8x1xf32>
    %cst_13 = arith.constant dense<0.000000e+00> : vector<1xf32>
    %45 = vector.multi_reduction <add>, %44, %cst_13 [0] : vector<8x1xf32> to vector<1xf32>
    %46 = vector.shape_cast %45 : vector<1xf32> to vector<1x1xf32>
    %c0_14 = arith.constant 0 : index
    %c0_15 = arith.constant 0 : index
    %47 = vector.load %arg4[%c0_14, %c0_15] : memref<1x1xf32, #tpu.memory_space<vmem>>, vector<1x1xf32>
    %48 = arith.addf %47, %46 : vector<1x1xf32>
    %c0_16 = arith.constant 0 : index
    %c0_17 = arith.constant 0 : index
    %49 = vector.load %arg4[%c0_16, %c0_17] : memref<1x1xf32, #tpu.memory_space<vmem>>, vector<1x1xf32>
    tpu.vector_store %arg4[%c0_16, %c0_17], %48 {strides = array<i32>} : memref<1x1xf32, #tpu.memory_space<vmem>>, vector<1x1xf32>,
    %c0_i32_18 = arith.constant 0 : i32
    %50 = arith.cmpi eq, %arg0, %c0_i32_18 : i32
    %51 = arith.extui %50 : i1 to i32
    %c0_i32_19 = arith.constant 0 : i32
    %52 = arith.cmpi ne, %51, %c0_i32_19 : i32
    scf.if %52 {
      %c0_20 = arith.constant 0 : index
      %c0_21 = arith.constant 0 : index
      %53 = vector.load %arg4[%c0_20, %c0_21] : memref<1x1xf32, #tpu.memory_space<vmem>>, vector<1x1xf32>
      %cst_22 = arith.constant 7.812500e-03 : f32
      %54 = vector.broadcast %cst_22 : f32 to vector<1x1xf32>
      %55 = arith.mulf %53, %54 : vector<1x1xf32>
      %c0_23 = arith.constant 0 : index
      %c0_24 = arith.constant 0 : index
      %56 = vector.load %arg4[%c0_23, %c0_24] : memref<1x1xf32, #tpu.memory_space<vmem>>, vector<1x1xf32>
      tpu.vector_store %arg4[%c0_23, %c0_24], %55 {strides = array<i32>} : memref<1x1xf32, #tpu.memory_space<vmem>>, vector<1x1xf32>,
    } else {
    }
    return
  }
  func.func @transform_0(%arg0: i32) -> (i32, i32) {
    %c0_i32 = arith.constant 0 : i32
    %c0_i32_0 = arith.constant 0 : i32
    return %arg0, %c0_i32 : i32, i32
  }
  func.func @transform_1(%arg0: i32) -> (i32, i32) {
    %c0_i32 = arith.constant 0 : i32
    %c0_i32_0 = arith.constant 0 : i32
    %c0_i32_1 = arith.constant 0 : i32
    return %c0_i32, %c0_i32_0 : i32, i32
  }
  func.func @transform_2(%arg0: i32) -> (i32, i32) {
    %c0_i32 = arith.constant 0 : i32
    %c0_i32_0 = arith.constant 0 : i32
    %c0_i32_1 = arith.constant 0 : i32
    return %c0_i32, %c0_i32_0 : i32, i32
  }
  func.func @transform_3(%arg0: i32) -> (i32, i32) {
    %c0_i32 = arith.constant 0 : i32
    %c0_i32_0 = arith.constant 0 : i32
    %c0_i32_1 = arith.constant 0 : i32
    return %c0_i32, %c0_i32_0 : i32, i32
  }
}

</mosaic_0001>

<bundles_post_ra>
// kernel: tpu_custom_call.1
= control target key start
LH: loop header
LB: loop body
LE: loop exit
PB: predicated region body
PF: predicated region fallthrough
CT: control target
= control target key end

     0   :  { %vm36_vm0 = vcmask 130048   ;;  %s179_s0 = inlined_call_operand.vmem [shape: f32[8,16], index: 0, kind: input, shape index: {}]   ;;  %s180_s1 = inlined_call_operand.vmem [shape: s32[8,1], index: 1, kind: input, shape index: {}]   ;;  %s181_s2 = inlined_call_operand.vmem [shape: f32[1,16], index: 2, kind: input, shape index: {}]   ;;  %s182_s3 = inlined_call_operand.hbm [shape: f32[1,1], index: 3, kind: output, shape index: {}]  }
   0x1   :  { %v21_v0 = vld [vmem:[%s179_s0] sm:$0xff] }
   0x2   :  { %8 = vsyncpa [#allocation3], 0  ;;  %v40_v1 = vsel %vm36_vm0, %v21_v0, -inf  ;;  %v24_v2 = vld [vmem:[%s180_s1] sm:$0xff]  ;;  %v135_v3 = vmov 0   ;;  %v26_v9 = vlaneseq  ;;  %vm19_vm2 = vcmask 0  }
   0x3   :  { %41 = vmax.xlane.f32.xlu0 %v40_v1  ;;  %100 = vset.pattern.permute.xlu1 %v135_v3  ;;  %v102_v11 = vld [vmem:[%s181_s2] ss:$0 sm:$0xff]  ;;  %v136_v29 = vmov 0.0   ;;  %s137_s1 = smov [#allocation2]   ;;  %s88_s19 = sshll.u32 %s182_s3, 4  ;;  %s89_s19 = int_to_ptr.hbm [resolvable:$true] %s88_s19 }
   0x4   :  { %101 = vset.pattern.permute.xlu0 %v135_v3  ;;  %29 = vperm.xlu1 %100, %v24_v2   ;;  %v27_v12 = vand.u32 127, %v26_v9  ;;  %20 = vst.msk [vmem:[#allocation2] sm:$0x1] %vm19_vm2, %v136_v29  ;;  %s86_s2 = sshll.u32 %s137_s1, 4  ;;  %s87_s2 = int_to_ptr.vmem [resolvable:$true] %s86_s2 }
   0xb   :  { %v71_v38 = vld [vmem:[#allocation2] sm:$0x1] }
  0x76   :  { %v42_v4 = vpop.xlane.xlu0 %41  ;;  %v30_v10 = vpop.permute.xlu1 %29 }
  0x77   :  { %v43_v5 = vsub.f32 %v21_v0, %v42_v4  ;;  %vm31_vm1 = vcmp.eq.s32.totalorder %v27_v12, %v30_v10 }
  0x78   :  { %v35_v13 = vsel %vm31_vm1, %v102_v11, 0.0 }
  0x79   :  { %v44_v6 = vmul.f32 1.442695, %v43_v5  ;;  %v37_v14 = vsel %vm36_vm0, %v35_v13, 0.0 }
  0x7a   :  { %38 = vadd.xlane.f32.xlu1 %v37_v14 }
  0x7b   :  { %103 = vpow2.f32 %v44_v6 }
  0x81   :  { %v104_v7 = vpop.eup %103 }
  0x82   :  { %v46_v8 = vsel %vm36_vm0, %v104_v7, 0.0 }
  0x83   :  { %47 = vadd.xlane.f32.xlu0 %v46_v8 }
  0xed   :  { %v39_v30 = vpop.xlane.xlu1 %38 }
  0xf6   :  { %v48_v15 = vpop.xlane.xlu0 %47 }
  0xf7   :  { %105 = vlog2.f32 %v48_v15  ;;  %v53_v16 = vsub.f32 %v48_v15, %v104_v7 }
  0xf9   :  { %107 = vlog2.f32 %v53_v16 }
  0xfd   :  { %v106_v17 = vpop.eup %105 }
  0xfe   :  { %v50_v18 = vmul.f32 0.6931472, %v106_v17 }
  0xff   :  { %v108_v19 = vpop.eup %107 }
 0x100   :  { %v51_v20 = vsub.f32 %v43_v5, %v50_v18  ;;  %v55_v21 = vmul.f32 0.6931472, %v108_v19 }
 0x102   :  { %v52_v22 = vmax.f32 %v51_v20, -100.0  ;;  %v56_v23 = vsub.f32 %v55_v21, %v50_v18 }
 0x104   :  { %v57_v24 = vmax.f32 %v56_v23, -100.0  ;;  %v58_v25 = vsub.f32 0.0, %v52_v22 }
 0x106   :  { %v59_v26 = vsub.f32 0.0, %v57_v24 }
 0x108   :  { %v60_v27 = vsel %vm31_vm1, %v58_v25, %v59_v26 }
 0x109   :  { %v61_v28 = vsel %vm36_vm0, %v60_v27, 0.0 }
 0x10a   :  { %62 = vadd.xlane.f32.xlu2 %v61_v28 }
 0x17d   :  { %v63_v31 = vpop.xlane.xlu2 %62 }
 0x17e   :  { %v64_v32 = vmul.f32 %v63_v31, %v39_v30 }
 0x180   :  { %v65_v33 = vrot.slane %v64_v32, 4 }
 0x182   :  { %v66_v34 = vadd.f32 %v65_v33, %v64_v32 }
 0x184   :  { %v67_v35 = vrot.slane %v66_v34, 2 }
 0x186   :  { %v68_v36 = vadd.f32 %v67_v35, %v66_v34 }
 0x188   :  { %v69_v37 = vrot.slane %v68_v36, 1 }
 0x18a   :  { %v70_v39 = vadd.f32 %v69_v37, %v68_v36 }
 0x18c   :  { %v72_v40 = vadd.f32 %v71_v38, %v70_v39 }
 0x18e   :  { %74 = vst.msk [vmem:[#allocation2] sm:$0x1] %vm19_vm2, %v72_v40 }
 0x195   :  { %v78_v41 = vld [vmem:[#allocation2] sm:$0x1] }
 0x196   :  { %v79_v42 = vmul.f32 0.0078125, %v78_v41 }
 0x198   :  { %80 = vst.msk [vmem:[#allocation2] sm:$0x1] %vm19_vm2, %v79_v42 }
 0x199   :  { %91 = dma.vmem_to_hbm [thread:$0]  %s87_s2, 16, %s89_s19, [#allocation3]  }
 0x19a   :  { %133 = dma.done.wait [#allocation3], 16  }
 0x19b   :  { %134 = vsyncadd [#allocation3], 4294967280 }
 0x19c   :  { %96 = vsyncpa [#allocation3], 1 }

</bundles_post_ra>
